<compile_context>
chip_gen: v5e
topology: v5e:2x2
jax: 0.10.0
libtpu: 0.0.40
codegen_flags: <defaults>
</compile_context>

<pallas_src>
import jax
import jax.numpy as jnp
from jax.experimental import pallas as pl
from jax.experimental.pallas import tpu as pltpu


def _round_up(x: int, m: int) -> int:
    return ((x + m - 1) // m) * m


def _cdiv(a: int, b: int) -> int:
    return (a + b - 1) // b


def generator_kernel(x_ref,
                     w1_ref, b1_ref,
                     w2_ref, b2_ref,
                     w3_ref, b3_ref,
                     w4_ref, b4_ref,
                     out_ref):
    """One batch tile of the 4-layer MLP, feature-major ([feat, TB])."""
    x = x_ref[...]                                    # [2, TB] f32

    # ---- Layer 1 (K=2): two VPU broadcast FMAs (MXU cannot be fed at K=2). ---
    # The [h_pad,1] weight-column / bias splats cost ~h_pad/8 XLU ops per grid
    # step (noise), so they are kept 1-lane wide rather than pre-broadcast.
    h = (w1_ref[:, 0:1] * x[0:1, :]
         + w1_ref[:, 1:2] * x[1:2, :]
         + b1_ref[...])                               # [h_pad, TB] f32
    h = jnp.maximum(h, 0.0).astype(jnp.bfloat16)      # bf16 feed for the MXU

    # ---- Layers 2/3: [h_pad,h_pad] bf16 @ [h_pad,TB] bf16, f32 acc (MXU). ----
    # TODO(synk): on v6e, evaluate making the [h,h] weight the MXU-stationary
    # operand (dot ordering / dot_general) and verify with a bundle dump.
    h = jnp.dot(w2_ref[...], h, preferred_element_type=jnp.float32) + b2_ref[...]
    h = jnp.maximum(h, 0.0).astype(jnp.bfloat16)

    h = jnp.dot(w3_ref[...], h, preferred_element_type=jnp.float32) + b3_ref[...]
    h = jnp.maximum(h, 0.0).astype(jnp.bfloat16)

    # ---- Layer 4: [2, h_pad] @ [h_pad, TB] -> [2, TB]. ----------------------
    o = jnp.dot(w4_ref[...], h, preferred_element_type=jnp.float32) + b4_ref[...]
    out_ref[...] = o.astype(out_ref.dtype)


def prepare_generator_params(params):
    """Host-side, one-time param prep: zero-pad h to a multiple of 128 (exact
    math, full MXU/lane tiles) and cast the MXU weights (layers 2-4) to bf16."""
    h_dim, in_dim = params["w1"].shape
    out_dim = params["w4"].shape[0]
    h_pad = max(128, _round_up(h_dim, 128))

    def pad2(a, rows, cols):
        a = a.astype(jnp.float32)
        return jnp.pad(a, ((0, rows - a.shape[0]), (0, cols - a.shape[1])))

    return {
        # layer 1 stays f32 (VPU path)
        "w1": pad2(params["w1"], h_pad, in_dim),
        "b1": pad2(params["b1"], h_pad, 1),
        # layers 2-4 feed the MXU in bf16 (f32 accumulation in-kernel)
        "w2": pad2(params["w2"], h_pad, h_pad).astype(jnp.bfloat16),
        "b2": pad2(params["b2"], h_pad, 1),
        "w3": pad2(params["w3"], h_pad, h_pad).astype(jnp.bfloat16),
        "b3": pad2(params["b3"], h_pad, 1),
        "w4": pad2(params["w4"], out_dim, h_pad).astype(jnp.bfloat16),
        "b4": pad2(params["b4"], out_dim, 1),
    }


def _vmem_capacity_bytes() -> int:
    """Best-effort VMEM capacity query; conservative (v7x-sized) fallback."""
    try:
        info = pltpu.get_tpu_info()
        cap = int(getattr(info, "vmem_capacity_bytes", 0))
        if cap > 0:
            return cap
    except Exception:
        pass
    return 64 << 20


def generator_forward(z, prep, *, max_tile=None):
    """z: [B, 2] float32.  prep: output of prepare_generator_params."""
    B, in_dim = z.shape
    h_pad = prep["w2"].shape[0]
    out_dim = prep["w4"].shape[0]

    # ---- generation-aware batch-tile sizing ---------------------------------
    vmem_cap = _vmem_capacity_bytes()
    if max_tile is None:
        # 128 MiB VMEM (v5e/v6e): bigger tiles amortize ~0.35us/step overhead.
        # 64 MiB VMEM (v7x): cap lower so f32 temporaries + weights still fit.
        max_tile = 4096 if vmem_cap >= (96 << 20) else 2048

    # Pad the batch only to the 128-lane quantum (not to TB): padding waste is
    # capped at <=127 columns for any B.
    B_pad = max(128, _round_up(B, 128))

    weights_and_biases = (
        prep["w1"], prep["b1"], prep["w2"], prep["b2"],
        prep["w3"], prep["b3"], prep["w4"], prep["b4"],
    )
    # Grid-invariant params (incl. their default double buffers) -- counted in
    # the budget so they never squeeze TB.  (Single-buffering them via
    # pipeline_mode=pl.Buffered(1) would reclaim ~1 MiB at bf16/h_pad=512.)
    w_bytes = 2 * sum(int(a.size) * a.dtype.itemsize for a in weights_and_biases)

    def vmem_estimate(tb):
        io = 2 * (in_dim * tb * 4) + 2 * (out_dim * tb * 4)   # dbl-buffered x/out
        temps = 3 * h_pad * tb * 4 + 2 * h_pad * tb * 2       # f32 acts + bf16 copies
        return io + temps + w_bytes

    budget = min(vmem_cap // 2, 72 << 20)
    tb = min(max_tile, B_pad)
    while tb > 128 and vmem_estimate(tb) > budget:
        tb -= 128
    # v7x: guarantee >=2 grid steps so the "parallel" batch axis feeds both
    # TensorCores (costs only ~0.35us on v5e/v6e's single TC).
    if B_pad >= 256:
        tb = min(tb, _round_up(_cdiv(B_pad, 2), 128))
    grid = (_cdiv(B_pad, tb),)

    vmem_limit = int(min(max(vmem_estimate(tb) + (12 << 20), 32 << 20),
                         vmem_cap - (8 << 20)))

    # Feature-major input [2, B_pad]; jnp.pad avoids an extra zero-init + copy.
    z_t = jnp.pad(z.astype(jnp.float32).T, ((0, 0), (0, B_pad - B)))

    # ---- BlockSpecs (explicit, no late-binding lambdas) ----------------------
    x_spec = pl.BlockSpec((in_dim, tb), lambda i: (0, i))
    out_spec = pl.BlockSpec((out_dim, tb), lambda i: (0, i))

    def resident_spec(arr):
        # Full array + constant block index: fetched once, stays VMEM-resident
        # across grid steps (no re-DMA when the block index repeats).
        return pl.BlockSpec(arr.shape, lambda i: (0, 0))

    in_specs = [x_spec] + [resident_spec(a) for a in weights_and_biases]

    # Advisory cost estimate (padded problem sizes).
    flops = 2 * B_pad * (in_dim * h_pad + 2 * h_pad * h_pad + h_pad * out_dim)
    bytes_accessed = 4 * B_pad * (in_dim + out_dim) + w_bytes // 2
    cost = pl.CostEstimate(flops=flops, transcendentals=0,
                           bytes_accessed=bytes_accessed)

    out_t = pl.pallas_call(
        generator_kernel,
        out_shape=jax.ShapeDtypeStruct((out_dim, B_pad), jnp.float32),
        grid=grid,
        in_specs=in_specs,
        out_specs=out_spec,
        compiler_params=pltpu.CompilerParams(
            dimension_semantics=("parallel",),
            vmem_limit_bytes=vmem_limit),
        cost_estimate=cost,
    )(z_t, *weights_and_biases)

    # Back to the module's [B, 2] layout (cheap 2-row transpose in the wrapper).
    return out_t[:, :B].T


def init_generator_params(key, h_dim=400, in_dim=2, out_dim=2):
    """Matches the PyTorch init: kaiming_normal_ (fan_in, leaky_relu a=0 =>
    std = sqrt(2/fan_in)), biases zero.  Weights stored as [out, in]."""
    ks = jax.random.split(key, 4)

    def kaiming(k, fan_out, fan_in):
        std = (2.0 / fan_in) ** 0.5
        return jax.random.normal(k, (fan_out, fan_in), dtype=jnp.float32) * std

    return {
        "w1": kaiming(ks[0], h_dim, in_dim),
        "b1": jnp.zeros((h_dim, 1), jnp.float32),
        "w2": kaiming(ks[1], h_dim, h_dim),
        "b2": jnp.zeros((h_dim, 1), jnp.float32),
        "w3": kaiming(ks[2], h_dim, h_dim),
        "b3": jnp.zeros((h_dim, 1), jnp.float32),
        "w4": kaiming(ks[3], out_dim, h_dim),
        "b4": jnp.zeros((out_dim, 1), jnp.float32),
    }


def reference_forward(z, p):
    h = jnp.maximum(z @ p["w1"].T + p["b1"].T, 0.0)
    h = jnp.maximum(h @ p["w2"].T + p["b2"].T, 0.0)
    h = jnp.maximum(h @ p["w3"].T + p["b3"].T, 0.0)
    return h @ p["w4"].T + p["b4"].T


if __name__ == "__main__":
    key = jax.random.PRNGKey(0)
    k_z, k_p, k_z2, k_p2 = jax.random.split(key, 4)

    fwd = jax.jit(generator_forward)

    # Test 1: small module-like shapes (batch=8, hidden=32).
    # Tolerance is loosened vs the f32 kernel: layers 2-4 use bf16 MXU inputs
    # with f32 accumulation.
    z = jax.random.normal(k_z, (8, 2), dtype=jnp.float32)
    params = init_generator_params(k_p, h_dim=32)
    prep = prepare_generator_params(params)
    out = jax.block_until_ready(fwd(z, prep))
    ref = reference_forward(z, params)
    assert out.shape == (8, 2)
    err = float(jnp.max(jnp.abs(out - ref)))
    assert jnp.allclose(out, ref, atol=3e-2, rtol=3e-2), f"max abs err {err}"

    # Test 2: ragged batch (exercises 128-quantum padding, a partial last grid
    # tile, and the >=2-step grid used for v7x's two TensorCores).
    z2 = jax.random.normal(k_z2, (300, 2), dtype=jnp.float32)
    params2 = init_generator_params(k_p2, h_dim=48)
    prep2 = prepare_generator_params(params2)
    out2 = jax.block_until_ready(fwd(z2, prep2))
    ref2 = reference_forward(z2, params2)
    assert out2.shape == (300, 2)
    err2 = float(jnp.max(jnp.abs(out2 - ref2)))
    assert jnp.allclose(out2, ref2, atol=3e-2, rtol=3e-2), f"max abs err {err2}"

    print("KERNEL_OK")
</pallas_src>

<mosaic_0001>
module attributes {stable_mosaic.version = 11 : i64} {
  func.func @generator_kernel(%arg0: i32, %arg1: memref<2x128xf32, #tpu.memory_space<vmem>>, %arg2: memref<128x2xf32, #tpu.memory_space<vmem>>, %arg3: memref<128x1xf32, #tpu.memory_space<vmem>>, %arg4: memref<128x128xbf16, #tpu.memory_space<vmem>>, %arg5: memref<128x1xf32, #tpu.memory_space<vmem>>, %arg6: memref<128x128xbf16, #tpu.memory_space<vmem>>, %arg7: memref<128x1xf32, #tpu.memory_space<vmem>>, %arg8: memref<2x128xbf16, #tpu.memory_space<vmem>>, %arg9: memref<2x1xf32, #tpu.memory_space<vmem>>, %arg10: memref<2x128xf32, #tpu.memory_space<vmem>>) attributes {dimension_semantics = [#tpu.dimension_semantics<parallel>], iteration_bounds = array<i64: 1>, scalar_prefetch = 0 : i64, scratch_operands = 0 : i64, tpu.core_type = #tpu.core_type<tc>, window_params = [{transform_indices = @transform_0, window_bounds = array<i64: 2, 128>}, {pipeline_mode = #tpu.pipeline_mode<synchronous>, transform_indices = @transform_1, window_bounds = array<i64: 128, 2>}, {pipeline_mode = #tpu.pipeline_mode<synchronous>, transform_indices = @transform_2, window_bounds = array<i64: 128, 1>}, {pipeline_mode = #tpu.pipeline_mode<synchronous>, transform_indices = @transform_3, window_bounds = array<i64: 128, 128>}, {pipeline_mode = #tpu.pipeline_mode<synchronous>, transform_indices = @transform_4, window_bounds = array<i64: 128, 1>}, {pipeline_mode = #tpu.pipeline_mode<synchronous>, transform_indices = @transform_5, window_bounds = array<i64: 128, 128>}, {pipeline_mode = #tpu.pipeline_mode<synchronous>, transform_indices = @transform_6, window_bounds = array<i64: 128, 1>}, {pipeline_mode = #tpu.pipeline_mode<synchronous>, transform_indices = @transform_7, window_bounds = array<i64: 2, 128>}, {pipeline_mode = #tpu.pipeline_mode<synchronous>, transform_indices = @transform_8, window_bounds = array<i64: 2, 1>}, {transform_indices = @transform_9, window_bounds = array<i64: 2, 128>}]} {
    %c0 = arith.constant 0 : index
    %c0_0 = arith.constant 0 : index
    %0 = vector.load %arg1[%c0, %c0_0] : memref<2x128xf32, #tpu.memory_space<vmem>>, vector<2x128xf32>
    %c0_1 = arith.constant 0 : index
    %c0_2 = arith.constant 0 : index
    %1 = vector.load %arg2[%c0_1, %c0_2] : memref<128x2xf32, #tpu.memory_space<vmem>>, vector<128x1xf32>
    %2 = vector.extract_strided_slice %0 {offsets = [0, 0], sizes = [1, 128], strides = [1, 1]} : vector<2x128xf32> to vector<1x128xf32>
    %3 = vector.broadcast %1 : vector<128x1xf32> to vector<128x128xf32>
    %4 = vector.broadcast %2 : vector<1x128xf32> to vector<128x128xf32>
    %5 = arith.mulf %3, %4 : vector<128x128xf32>
    %c0_3 = arith.constant 0 : index
    %c1 = arith.constant 1 : index
    %6 = vector.load %arg2[%c0_3, %c1] : memref<128x2xf32, #tpu.memory_space<vmem>>, vector<128x1xf32>
    %7 = vector.extract_strided_slice %0 {offsets = [1, 0], sizes = [1, 128], strides = [1, 1]} : vector<2x128xf32> to vector<1x128xf32>
    %8 = vector.broadcast %6 : vector<128x1xf32> to vector<128x128xf32>
    %9 = vector.broadcast %7 : vector<1x128xf32> to vector<128x128xf32>
    %10 = arith.mulf %8, %9 : vector<128x128xf32>
    %11 = arith.addf %5, %10 : vector<128x128xf32>
    %c0_4 = arith.constant 0 : index
    %c0_5 = arith.constant 0 : index
    %12 = vector.load %arg3[%c0_4, %c0_5] : memref<128x1xf32, #tpu.memory_space<vmem>>, vector<128x1xf32>
    %13 = vector.broadcast %12 : vector<128x1xf32> to vector<128x128xf32>
    %14 = arith.addf %11, %13 : vector<128x128xf32>
    %cst = arith.constant 0.000000e+00 : f32
    %15 = vector.broadcast %cst : f32 to vector<128x128xf32>
    %16 = arith.maximumf %14, %15 : vector<128x128xf32>
    %17 = arith.truncf %16 : vector<128x128xf32> to vector<128x128xbf16>
    %c0_6 = arith.constant 0 : index
    %c0_7 = arith.constant 0 : index
    %18 = vector.load %arg4[%c0_6, %c0_7] : memref<128x128xbf16, #tpu.memory_space<vmem>>, vector<128x128xbf16>
    %cst_8 = arith.constant dense<0.000000e+00> : vector<128x128xf32>
    %19 = tpu.matmul %18, %17, %cst_8 {dimension_numbers = #tpu.dot_dimension_numbers<[1], [0], [0], [1], [0, 0, 1, 1], [], []>} : vector<128x128xbf16>, vector<128x128xbf16>, vector<128x128xf32> -> vector<128x128xf32>
    %c0_9 = arith.constant 0 : index
    %c0_10 = arith.constant 0 : index
    %20 = vector.load %arg5[%c0_9, %c0_10] : memref<128x1xf32, #tpu.memory_space<vmem>>, vector<128x1xf32>
    %21 = vector.broadcast %20 : vector<128x1xf32> to vector<128x128xf32>
    %22 = arith.addf %19, %21 : vector<128x128xf32>
    %cst_11 = arith.constant 0.000000e+00 : f32
    %23 = vector.broadcast %cst_11 : f32 to vector<128x128xf32>
    %24 = arith.maximumf %22, %23 : vector<128x128xf32>
    %25 = arith.truncf %24 : vector<128x128xf32> to vector<128x128xbf16>
    %c0_12 = arith.constant 0 : index
    %c0_13 = arith.constant 0 : index
    %26 = vector.load %arg6[%c0_12, %c0_13] : memref<128x128xbf16, #tpu.memory_space<vmem>>, vector<128x128xbf16>
    %cst_14 = arith.constant dense<0.000000e+00> : vector<128x128xf32>
    %27 = tpu.matmul %26, %25, %cst_14 {dimension_numbers = #tpu.dot_dimension_numbers<[1], [0], [0], [1], [0, 0, 1, 1], [], []>} : vector<128x128xbf16>, vector<128x128xbf16>, vector<128x128xf32> -> vector<128x128xf32>
    %c0_15 = arith.constant 0 : index
    %c0_16 = arith.constant 0 : index
    %28 = vector.load %arg7[%c0_15, %c0_16] : memref<128x1xf32, #tpu.memory_space<vmem>>, vector<128x1xf32>
    %29 = vector.broadcast %28 : vector<128x1xf32> to vector<128x128xf32>
    %30 = arith.addf %27, %29 : vector<128x128xf32>
    %cst_17 = arith.constant 0.000000e+00 : f32
    %31 = vector.broadcast %cst_17 : f32 to vector<128x128xf32>
    %32 = arith.maximumf %30, %31 : vector<128x128xf32>
    %33 = arith.truncf %32 : vector<128x128xf32> to vector<128x128xbf16>
    %c0_18 = arith.constant 0 : index
    %c0_19 = arith.constant 0 : index
    %34 = vector.load %arg8[%c0_18, %c0_19] : memref<2x128xbf16, #tpu.memory_space<vmem>>, vector<2x128xbf16>
    %cst_20 = arith.constant dense<0.000000e+00> : vector<2x128xf32>
    %35 = tpu.matmul %34, %33, %cst_20 {dimension_numbers = #tpu.dot_dimension_numbers<[1], [0], [0], [1], [0, 0, 1, 1], [], []>} : vector<2x128xbf16>, vector<128x128xbf16>, vector<2x128xf32> -> vector<2x128xf32>
    %c0_21 = arith.constant 0 : index
    %c0_22 = arith.constant 0 : index
    %36 = vector.load %arg9[%c0_21, %c0_22] : memref<2x1xf32, #tpu.memory_space<vmem>>, vector<2x1xf32>
    %37 = vector.broadcast %36 : vector<2x1xf32> to vector<2x128xf32>
    %38 = arith.addf %35, %37 : vector<2x128xf32>
    %c0_23 = arith.constant 0 : index
    %c0_24 = arith.constant 0 : index
    %39 = vector.load %arg10[%c0_23, %c0_24] : memref<2x128xf32, #tpu.memory_space<vmem>>, vector<2x128xf32>
    tpu.vector_store %arg10[%c0_23, %c0_24], %38 {strides = array<i32>} : memref<2x128xf32, #tpu.memory_space<vmem>>, vector<2x128xf32>,
    return
  }
  func.func @transform_0(%arg0: i32) -> (i32, i32) {
    %c0_i32 = arith.constant 0 : i32
    %c0_i32_0 = arith.constant 0 : i32
    return %c0_i32, %arg0 : i32, i32
  }
  func.func @transform_1(%arg0: i32) -> (i32, i32) {
    %c0_i32 = arith.constant 0 : i32
    %c0_i32_0 = arith.constant 0 : i32
    %c0_i32_1 = arith.constant 0 : i32
    return %c0_i32, %c0_i32_0 : i32, i32
  }
  func.func @transform_2(%arg0: i32) -> (i32, i32) {
    %c0_i32 = arith.constant 0 : i32
    %c0_i32_0 = arith.constant 0 : i32
    %c0_i32_1 = arith.constant 0 : i32
    return %c0_i32, %c0_i32_0 : i32, i32
  }
  func.func @transform_3(%arg0: i32) -> (i32, i32) {
    %c0_i32 = arith.constant 0 : i32
    %c0_i32_0 = arith.constant 0 : i32
    %c0_i32_1 = arith.constant 0 : i32
    return %c0_i32, %c0_i32_0 : i32, i32
  }
  func.func @transform_4(%arg0: i32) -> (i32, i32) {
    %c0_i32 = arith.constant 0 : i32
    %c0_i32_0 = arith.constant 0 : i32
    %c0_i32_1 = arith.constant 0 : i32
    return %c0_i32, %c0_i32_0 : i32, i32
  }
  func.func @transform_5(%arg0: i32) -> (i32, i32) {
    %c0_i32 = arith.constant 0 : i32
    %c0_i32_0 = arith.constant 0 : i32
    %c0_i32_1 = arith.constant 0 : i32
    return %c0_i32, %c0_i32_0 : i32, i32
  }
  func.func @transform_6(%arg0: i32) -> (i32, i32) {
    %c0_i32 = arith.constant 0 : i32
    %c0_i32_0 = arith.constant 0 : i32
    %c0_i32_1 = arith.constant 0 : i32
    return %c0_i32, %c0_i32_0 : i32, i32
  }
  func.func @transform_7(%arg0: i32) -> (i32, i32) {
    %c0_i32 = arith.constant 0 : i32
    %c0_i32_0 = arith.constant 0 : i32
    %c0_i32_1 = arith.constant 0 : i32
    return %c0_i32, %c0_i32_0 : i32, i32
  }
  func.func @transform_8(%arg0: i32) -> (i32, i32) {
    %c0_i32 = arith.constant 0 : i32
    %c0_i32_0 = arith.constant 0 : i32
    %c0_i32_1 = arith.constant 0 : i32
    return %c0_i32, %c0_i32_0 : i32, i32
  }
  func.func @transform_9(%arg0: i32) -> (i32, i32) {
    %c0_i32 = arith.constant 0 : i32
    %c0_i32_0 = arith.constant 0 : i32
    return %c0_i32, %arg0 : i32, i32
  }
}

</mosaic_0001>

<bundles_post_ra>
// kernel: generator_forward.1
= control target key start
LH: loop header
LB: loop body
LE: loop exit
PB: predicated region body
PF: predicated region fallthrough
CT: control target
= control target key end

     0   :  { %v993_v0 = vmov 1   ;;  %v994_v3 = vmov 0   ;;  %s1389_s1 = inlined_call_operand.vmem [shape: f32[128,2], index: 1, kind: input, shape index: {}]   ;;  %s1390_s2 = inlined_call_operand.vmem [shape: f32[128,1], index: 2, kind: input, shape index: {}]   ;;  %s1391_s4 = inlined_call_operand.vmem [shape: f32[128,1], index: 4, kind: input, shape index: {}]   ;;  %s1392_s0 = inlined_call_operand.vmem [shape: f32[2,128], index: 0, kind: input, shape index: {}]   ;;  %s1393_s6 = inlined_call_operand.vmem [shape: f32[128,1], index: 6, kind: input, shape index: {}]   ;;  %s1394_s8 = inlined_call_operand.vmem [shape: f32[2,1], index: 8, kind: input, shape index: {}]   ;;  %s1395_s3 = inlined_call_operand.vmem [shape: bf16[128,128], index: 3, kind: input, shape index: {}]   ;;  %s1396_s5 = inlined_call_operand.vmem [shape: bf16[128,128], index: 5, kind: input, shape index: {}]   ;;  %s1397_s7 = inlined_call_operand.vmem [shape: bf16[2,128], index: 7, kind: input, shape index: {}]   ;;  %s1398_s9 = inlined_call_operand.vmem [shape: f32[2,128], index: 9, kind: output, shape index: {}]  }
   0x1   :  { %970 = vset.pattern.permute.xlu0 %v993_v0  ;;  %968 = vset.pattern.permute.xlu1 %v993_v0  ;;  %v47_v1 = vld [vmem:[%s1389_s1 + $0x70] sm:$0xff]  ;;  %v45_v2 = vld [vmem:[%s1389_s1 + $0x60] sm:$0xff]  ;;  %v48_v4 = vld [vmem:[%s1389_s1 + $0x78] sm:$0xff] }
   0x2   :  { %969 = vset.pattern.permute.xlu2 %v994_v3  ;;  %203 = vperm.xlu1 %968, %v47_v1   ;;  %v46_v5 = vld [vmem:[%s1389_s1 + $0x68] sm:$0xff]  ;;  %v257_v7 = vld [vmem:[%s1390_s2 + $0x70] sm:$0xff]  ;;  %v258_v10 = vld [vmem:[%s1390_s2 + $0x78] sm:$0xff] }
   0x3   :  { %195 = vperm.xlu0 %970, %v45_v2   ;;  %111 = vperm.xlu2 %969, %v45_v2   ;;  %v42_v6 = vld [vmem:[%s1389_s1 + $0x48] sm:$0xff]  ;;  %v39_v8 = vld [vmem:[%s1389_s1 + $0x30] sm:$0xff]  ;;  %v44_v11 = vld [vmem:[%s1389_s1 + $0x58] sm:$0xff] }
   0x4   :  { %v43_v9 = vld [vmem:[%s1389_s1 + $0x50] sm:$0xff]  ;;  %v256_v12 = vld [vmem:[%s1390_s2 + $0x68] sm:$0xff]  ;;  %v255_v13 = vld [vmem:[%s1390_s2 + $0x60] sm:$0xff] }
   0x5   :  { %v41_v14 = vld [vmem:[%s1389_s1 + $0x40] sm:$0xff]  ;;  %v252_v15 = vld [vmem:[%s1390_s2 + $0x48] sm:$0xff]  ;;  %v253_v16 = vld [vmem:[%s1390_s2 + $0x50] sm:$0xff] }
   0x6   :  { %v254_v17 = vld [vmem:[%s1390_s2 + $0x58] sm:$0xff]  ;;  %v249_v18 = vld [vmem:[%s1390_s2 + $0x30] sm:$0xff]  ;;  %v251_v21 = vld [vmem:[%s1390_s2 + $0x40] sm:$0xff] }
   0x7   :  { %v40_v19 = vld [vmem:[%s1389_s1 + $0x38] sm:$0xff]  ;;  %v247_v22 = vld [vmem:[%s1390_s2 + $0x20] sm:$0xff]  ;;  %v38_v23 = vld [vmem:[%s1389_s1 + $0x28] sm:$0xff] }
   0x8   :  { %v36_v20 = vld [vmem:[%s1389_s1 + $0x18] sm:$0xff]  ;;  %v37_v24 = vld [vmem:[%s1389_s1 + $0x20] sm:$0xff]  ;;  %v34_v25 = vld [vmem:[%s1389_s1 + $0x8] sm:$0xff] }
   0x9   :  { %v245_v27 = vld [vmem:[%s1390_s2 + $0x10] sm:$0xff]  ;;  %v250_v30 = vld [vmem:[%s1390_s2 + $0x38] sm:$0xff]  ;;  %v244_v31 = vld [vmem:[%s1390_s2 + $0x8] sm:$0xff] }
   0xa   :  { %207 = vperm.xlu1 %968, %v48_v4   ;;  %v35_v29 = vld [vmem:[%s1389_s1 + $0x10] sm:$0xff]  ;;  %v407_v33 = vld [vmem:[%s1391_s4 + $0x60] sm:$0xff]  ;;  %v248_v38 = vld [vmem:[%s1390_s2 + $0x28] sm:$0xff] }
   0xb   :  { %116 = vperm.xlu2 %969, %v46_v5   ;;  %183 = vperm.xlu0 %970, %v42_v6   ;;  %v33_v37 = vld [vmem:[%s1389_s1] sm:$0xff]  ;;  %v406_v39 = vld [vmem:[%s1391_s4 + $0x58] sm:$0xff]  ;;  %v401_v43 = vld [vmem:[%s1391_s4 + $0x30] sm:$0xff] }
   0xc   :  { %v400_v47 = vld [vmem:[%s1391_s4 + $0x28] sm:$0xff]  ;;  %v243_v48 = vld [vmem:[%s1390_s2] sm:$0xff]  ;;  %v246_v49 = vld [vmem:[%s1390_s2 + $0x18] sm:$0xff] }
   0xd   :  { %v32_v50 = vld [vmem:[%s1392_s0] sm:$0x3]  ;;  %v410_v58 = vld [vmem:[%s1391_s4 + $0x78] sm:$0xff]  ;;  %v409_v60 = vld [vmem:[%s1391_s4 + $0x70] sm:$0xff] }
   0xe   :  { %v1195_v53 = vperm.slane %v32_v50, 0  ;;  %v1197_v54 = vperm.slane %v32_v50, 1  ;;  %v395_v57 = vld [vmem:[%s1391_s4] sm:$0xff] }
  0x12   :  { %199 = vperm.xlu1 %968, %v46_v5   ;;  %v643_v5 = vld [vmem:[%s1393_s6 + $0x78] sm:$0xff] }
  0x13   :  { %331 = vperm.xlu2 %969, %v257_v7   ;;  %171 = vperm.xlu0 %970, %v39_v8  }
  0x1a   :  { %971 = vset.pattern.permute.xlu1 %v994_v3 }
  0x1b   :  { %101 = vperm.xlu2 %969, %v43_v9   ;;  %978 = vset.pattern.permute.xlu0 %v994_v3 }
  0x1c   :  { %336 = vperm.xlu1 %971, %v258_v10   ;;  %121 = vperm.xlu0 %978, %v47_v1   ;;  %v405_v10 = vld [vmem:[%s1391_s4 + $0x50] sm:$0xff] }
  0x23   :  { %973 = vset.pattern.permute.xlu2 %v993_v0 }
  0x24   :  { %972 = vset.pattern.permute.xlu1 %v993_v0  ;;  %191 = vperm.xlu2 %973, %v44_v11  }
  0x25   :  { %126 = vperm.xlu0 %978, %v48_v4   ;;  %187 = vperm.xlu1 %972, %v43_v9  }
  0x2c   :  { %975 = vset.pattern.permute.xlu2 %v994_v3 }
  0x2d   :  { %106 = vperm.xlu0 %978, %v44_v11   ;;  %974 = vset.pattern.permute.xlu1 %v994_v3 }
  0x2e   :  { %326 = vperm.xlu2 %975, %v256_v12   ;;  %321 = vperm.xlu1 %974, %v255_v13   ;;  %v408_v12 = vld [vmem:[%s1391_s4 + $0x68] sm:$0xff] }
  0x35   :  { %91 = vperm.xlu0 %978, %v41_v14  }
  0x36   :  { %976 = vset.pattern.permute.xlu2 %v993_v0  ;;  %96 = vperm.xlu1 %974, %v42_v6  }
  0x37   :  { %179 = vperm.xlu2 %976, %v41_v14  }
  0x3d   :  { %306 = vperm.xlu0 %978, %v252_v15  }
  0x3e   :  { %311 = vperm.xlu1 %974, %v253_v16  }
  0x3f   :  { %977 = vset.pattern.permute.xlu2 %v994_v3 }
  0x40   :  { %316 = vperm.xlu2 %977, %v254_v17  }
  0x45   :  { %291 = vperm.xlu0 %978, %v249_v18  }
  0x46   :  { %81 = vperm.xlu1 %974, %v39_v8  }
  0x48   :  { %86 = vperm.xlu2 %977, %v40_v19  }
  0x4d   :  { %66 = vperm.xlu0 %978, %v36_v20  }
  0x4e   :  { %979 = vset.pattern.permute.xlu1 %v993_v0 }
  0x4f   :  { %175 = vperm.xlu1 %979, %v40_v19  }
  0x50   :  { %301 = vperm.xlu2 %977, %v251_v21  }
  0x55   :  { %281 = vperm.xlu0 %978, %v247_v22   ;;  %v638_v22 = vld [vmem:[%s1393_s6 + $0x50] sm:$0xff] }
  0x57   :  { %980 = vset.pattern.permute.xlu1 %v994_v3 }
  0x58   :  { %76 = vperm.xlu2 %977, %v38_v23   ;;  %71 = vperm.xlu1 %980, %v37_v24  }
  0x5d   :  { %56 = vperm.xlu0 %978, %v34_v25   ;;  %v1130_v26 = vpop.permute.xlu2 %111 }
  0x5e   :  { %v142_v7 = vmul.f32 %v1195_v53, %v1130_v26  ;;  %v403_v26 = vld [vmem:[%s1391_s4 + $0x40] sm:$0xff] }
  0x60   :  { %982 = vset.pattern.permute.xlu2 %v993_v0  ;;  %981 = vset.pattern.permute.xlu1 %v993_v0 }
  0x61   :  { %167 = vperm.xlu2 %982, %v38_v23   ;;  %163 = vperm.xlu1 %981, %v37_v24  }
  0x65   :  { %271 = vperm.xlu0 %978, %v245_v27   ;;  %v1137_v28 = vpop.permute.xlu2 %116 }
  0x69   :  { %984 = vset.pattern.permute.xlu2 %v994_v3  ;;  %983 = vset.pattern.permute.xlu1 %v994_v3 }
  0x6a   :  { %61 = vperm.xlu2 %984, %v35_v29   ;;  %296 = vperm.xlu1 %983, %v250_v30  }
  0x6d   :  { %266 = vperm.xlu0 %978, %v244_v31   ;;  %v1150_v32 = vpop.permute.xlu2 %331 }
  0x72   :  { %986 = vset.pattern.permute.xlu2 %v993_v0  ;;  %985 = vset.pattern.permute.xlu1 %v993_v0 }
  0x73   :  { %159 = vperm.xlu2 %986, %v36_v20   ;;  %155 = vperm.xlu1 %985, %v35_v29  }
  0x74   :  { %v204_v34 = vpop.permute.xlu1 %203 }
  0x75   :  { %473 = vperm.xlu0 %978, %v407_v33   ;;  %v196_v35 = vpop.permute.xlu0 %195  ;;  %v1157_v36 = vpop.permute.xlu2 %101  ;;  %v225_v59 = vmul.f32 %v1197_v54, %v204_v34 }
  0x76   :  { %v223_v8 = vmul.f32 %v1197_v54, %v196_v35  ;;  %v637_v35 = vld [vmem:[%s1393_s6 + $0x48] sm:$0xff] }
  0x78   :  { %v239_v18 = vadd.f32 %v223_v8, %v142_v7  ;;  %v641_v7 = vld [vmem:[%s1393_s6 + $0x68] sm:$0xff]  ;;  %v640_v8 = vld [vmem:[%s1393_s6 + $0x60] sm:$0xff] }
  0x7b   :  { %988 = vset.pattern.permute.xlu2 %v994_v3  ;;  %987 = vset.pattern.permute.xlu1 %v994_v3 }
  0x7c   :  { %51 = vperm.xlu2 %988, %v33_v37   ;;  %286 = vperm.xlu1 %987, %v248_v38   ;;  %v208_v40 = vpop.permute.xlu1 %207 }
  0x7d   :  { %468 = vperm.xlu0 %978, %v406_v39   ;;  %v1170_v41 = vpop.permute.xlu0 %183  ;;  %v226_v1 = vmul.f32 %v1197_v54, %v208_v40  ;;  %v399_v40 = vld [vmem:[%s1391_s4 + $0x20] sm:$0xff] }
  0x7e   :  { %v1172_v42 = vpop.permute.xlu2 %191 }
  0x84   :  { %990 = vset.pattern.permute.xlu2 %v993_v0  ;;  %989 = vset.pattern.permute.xlu1 %v993_v0  ;;  %v200_v44 = vpop.permute.xlu1 %199 }
  0x85   :  { %443 = vperm.xlu0 %978, %v401_v43   ;;  %151 = vperm.xlu2 %990, %v34_v25   ;;  %v1179_v45 = vpop.permute.xlu0 %171  ;;  %v224_v62 = vmul.f32 %v1197_v54, %v200_v44  ;;  %v404_v25 = vld [vmem:[%s1391_s4 + $0x48] sm:$0xff]  ;;  %v140_v43 = vmul.f32 %v1195_v53, %v1157_v36  ;;  %v220_v44 = vmul.f32 %v1197_v54, %v1170_v41  ;;  %v632_v36 = vld [vmem:[%s1393_s6 + $0x20] sm:$0xff]  ;;  %v398_v41 = vld [vmem:[%s1391_s4 + $0x18] sm:$0xff] }
  0x86   :  { %147 = vperm.xlu1 %989, %v33_v37  }
  0x88   :  { %v327_v46 = vpop.permute.xlu2 %326 }
  0x8d   :  { %438 = vperm.xlu0 %978, %v400_v47   ;;  %992 = vset.pattern.permute.xlu2 %v994_v3 }
  0x8e   :  { %991 = vset.pattern.permute.xlu1 %v994_v3  ;;  %261 = vperm.xlu2 %992, %v243_v48   ;;  %v337_v51 = vpop.permute.xlu1 %336  ;;  %v122_v52 = vpop.permute.xlu0 %121  ;;  %v143_v3 = vmul.f32 %v1195_v53, %v1137_v28 }
  0x8f   :  { %276 = vperm.xlu1 %991, %v246_v49   ;;  %v144_v55 = vmul.f32 %v1195_v53, %v122_v52 }
  0x90   :  { %v240_v9 = vadd.f32 %v224_v62, %v143_v3  ;;  %v642_v3 = vld [vmem:[%s1393_s6 + $0x70] sm:$0xff] }
  0x91   :  { %v180_v56 = vpop.permute.xlu2 %179  ;;  %v241_v61 = vadd.f32 %v225_v59, %v144_v55 }
  0x92   :  { %v352_v16 = vadd.f32 %v327_v46, %v240_v9  ;;  %v219_v33 = vmul.f32 %v1197_v54, %v180_v56 }
  0x93   :  { %v353_v6 = vadd.f32 %v1150_v32, %v241_v61  ;;  %v222_v32 = vmul.f32 %v1197_v54, %v1172_v42  ;;  %v402_v42 = vld [vmem:[%s1391_s4 + $0x38] sm:$0xff] }
  0x94   :  { %v368_v23 = vmax.f32 %v352_v16, 0.0 }
  0x95   :  { %413 = vperm.xlu0 %978, %v395_v57   ;;  %v369_v14 = vmax.f32 %v353_v6, 0.0  ;;  %v846_v6 = vld [vmem:[%s1394_s8] sm:$0x3] }
  0x96   :  { %488 = vperm.xlu2 %992, %v410_v58  }
  0x97   :  { %v127_v63 = vpop.permute.xlu0 %126  ;;  %483 = vperm.xlu1 %991, %v409_v60   ;;  %v188_v0 = vpop.permute.xlu1 %187  ;;  %v397_v60 = vld [vmem:[%s1391_s4 + $0x10] sm:$0xff] }
  0x98   :  { %v145_v2 = vmul.f32 %v1195_v53, %v127_v63  ;;  %v221_v37 = vmul.f32 %v1197_v54, %v188_v0 }
  0x9a   :  { %v242_v4 = vadd.f32 %v226_v1, %v145_v2  ;;  %v317_v11 = vpop.permute.xlu2 %316  ;;  %v237_v49 = vadd.f32 %v221_v37, %v140_v43  ;;  %v631_v2 = vld [vmem:[%s1393_s6 + $0x18] sm:$0xff] }
  0x9c   :  { %v354_v13 = vadd.f32 %v337_v51, %v242_v4  ;;  %v396_v4 = vld [vmem:[%s1391_s4 + $0x8] sm:$0xff] }
  0x9d   :  { %721 = vperm.xlu0 %978, %v643_v5  }
  0x9e   :  { %463 = vperm.xlu2 %992, %v405_v10   ;;  %v370_v15 = vmax.f32 %v354_v13, 0.0 }
  0x9f   :  { %v107_v17 = vpop.permute.xlu0 %106  ;;  %478 = vperm.xlu1 %991, %v408_v12   ;;  %v639_v12 = vld [vmem:[%s1393_s6 + $0x58] sm:$0xff] }
  0xa0   :  { %v322_v19 = vpop.permute.xlu1 %321  ;;  %v378_v20 = vpack.c.bf16 %v370_v15, %v369_v14  ;;  %v141_v29 = vmul.f32 %v1195_v53, %v107_v17  ;;  %v635_v17 = vld [vmem:[%s1393_s6 + $0x38] sm:$0xff] }
  0xa1   :  { %v351_v21 = vadd.f32 %v322_v19, %v239_v18  ;;  %v634_v18 = vld [vmem:[%s1393_s6 + $0x30] sm:$0xff]  ;;  %v217_v19 = vmul.f32 %v1197_v54, %v1179_v45  ;;  %v633_v45 = vld [vmem:[%s1393_s6 + $0x28] sm:$0xff] }
  0xa2   :  { %539 = vmatpush.bf16.msra.mxu0 %v378_v20  ;;  %950 = vmatpush.bf16.msra.mxu3 %v378_v20  ;;  %v1237_v28 = vpop.permute.xlu2 %86  ;;  %v238_v38 = vadd.f32 %v222_v32, %v141_v29 }
  0xa3   :  { %v367_v24 = vmax.f32 %v351_v21, 0.0 }
  0xa4   :  { %v350_v50 = vadd.f32 %v317_v11, %v238_v38  ;;  %v636_v11 = vld [vmem:[%s1393_s6 + $0x40] sm:$0xff] }
  0xa5   :  { %696 = vperm.xlu0 %978, %v638_v22   ;;  %v377_v27 = vpack.c.bf16 %v368_v23, %v367_v24  ;;  %v137_v22 = vmul.f32 %v1195_v53, %v1237_v28  ;;  %v629_v28 = vld [vmem:[%s1393_s6 + $0x8] sm:$0xff] }
  0xa6   :  { %458 = vperm.xlu2 %992, %v404_v25   ;;  %v366_v59 = vmax.f32 %v350_v50, 0.0 }
  0xa7   :  { %v92_v30 = vpop.permute.xlu0 %91  ;;  %453 = vperm.xlu1 %991, %v403_v26   ;;  %540 = vmatpush.bf16.msra.mxu0 %v377_v27  ;;  %v630_v26 = vld [vmem:[%s1393_s6 + $0x10] sm:$0xff] }
  0xa8   :  { %951 = vmatpush.bf16.msra.mxu3 %v377_v27  ;;  %v97_v31 = vpop.permute.xlu1 %96  ;;  %v138_v34 = vmul.f32 %v1195_v53, %v92_v30 }
  0xa9   :  { %v139_v39 = vmul.f32 %v1195_v53, %v97_v31 }
  0xaa   :  { %v235_v46 = vadd.f32 %v219_v33, %v138_v34  ;;  %v302_v51 = vpop.permute.xlu2 %301 }
  0xab   :  { %v236_v48 = vadd.f32 %v220_v44, %v139_v39 }
  0xac   :  { %v347_v55 = vadd.f32 %v302_v51, %v235_v46 }
  0xad   :  { %691 = vperm.xlu0 %978, %v637_v35   ;;  %v628_v35 = vld [vmem:[%s1393_s6] sm:$0xff] }
  0xae   :  { %433 = vperm.xlu2 %992, %v399_v40   ;;  %v363_v61 = vmax.f32 %v347_v55, 0.0 }
  0xaf   :  { %v307_v47 = vpop.permute.xlu0 %306  ;;  %448 = vperm.xlu1 %991, %v402_v42  }
  0xb0   :  { %v312_v52 = vpop.permute.xlu1 %311  ;;  %v348_v56 = vadd.f32 %v307_v47, %v236_v48 }
  0xb1   :  { %v349_v57 = vadd.f32 %v312_v52, %v237_v49 }
  0xb2   :  { %v364_v62 = vmax.f32 %v348_v56, 0.0  ;;  %v77_v9 = vpop.permute.xlu2 %76 }
  0xb3   :  { %v365_v58 = vmax.f32 %v349_v57, 0.0  ;;  %v135_v44 = vmul.f32 %v1195_v53, %v77_v9 }
  0xb4   :  { %v375_v1 = vpack.c.bf16 %v364_v62, %v363_v61 }
  0xb5   :  { %666 = vperm.xlu0 %978, %v632_v36   ;;  %v376_v63 = vpack.c.bf16 %v366_v59, %v365_v58 }
  0xb6   :  { %428 = vperm.xlu2 %992, %v398_v41  }
  0xb7   :  { %423 = vperm.xlu1 %991, %v397_v60   ;;  %541 = vmatpush.bf16.msra.mxu0 %v376_v63  ;;  %v292_v13 = vpop.permute.xlu0 %291 }
  0xb8   :  { %952 = vmatpush.bf16.msra.mxu3 %v376_v63  ;;  %v82_v0 = vpop.permute.xlu1 %81 }
  0xb9   :  { %v136_v14 = vmul.f32 %v1195_v53, %v82_v0 }
  0xbb   :  { %542 = vmatpush.bf16.msra.mxu0 %v375_v1  ;;  %v168_v15 = vpop.permute.xlu2 %167  ;;  %v233_v20 = vadd.f32 %v217_v19, %v136_v14  ;;  %v935_v19 = vld [vmem:[%s1395_s3 + $0x8] sm:$0xff] }
  0xbc   :  { %953 = vmatpush.bf16.msra.mxu3 %v375_v1  ;;  %v216_v42 = vmul.f32 %v1197_v54, %v168_v15 }
  0xbd   :  { %661 = vperm.xlu0 %978, %v631_v2   ;;  %v345_v27 = vadd.f32 %v292_v13, %v233_v20  ;;  %v940_v20 = vld [vmem:[%s1395_s3 + $0x30] sm:$0xff] }
  0xbe   :  { %716 = vperm.xlu2 %992, %v642_v3   ;;  %v232_v47 = vadd.f32 %v216_v42, %v135_v44 }
  0xbf   :  { %418 = vperm.xlu1 %991, %v396_v4   ;;  %v67_v23 = vpop.permute.xlu0 %66  ;;  %v361_v32 = vmax.f32 %v345_v27, 0.0 }
  0xc0   :  { %v133_v1 = vmul.f32 %v1195_v53, %v67_v23  ;;  %v937_v23 = vld [vmem:[%s1395_s3 + $0x18] sm:$0xff] }
  0xc1   :  { %v176_v5 = vpop.permute.xlu1 %175 }
  0xc2   :  { %v218_v21 = vmul.f32 %v1197_v54, %v176_v5 }
  0xc4   :  { %v62_v24 = vpop.permute.xlu2 %61  ;;  %v234_v25 = vadd.f32 %v218_v21, %v137_v22  ;;  %v936_v21 = vld [vmem:[%s1395_s3 + $0x10] sm:$0xff]  ;;  %v941_v22 = vld [vmem:[%s1395_s3 + $0x38] sm:$0xff] }
  0xc5   :  { %849 = vperm.xlu0 %978, %v846_v6   ;;  %v132_v59 = vmul.f32 %v1195_v53, %v62_v24  ;;  %v938_v24 = vld [vmem:[%s1395_s3 + $0x20] sm:$0xff] }
  0xc6   :  { %711 = vperm.xlu2 %992, %v641_v7  }
  0xc7   :  { %706 = vperm.xlu1 %991, %v640_v8   ;;  %v282_v34 = vpop.permute.xlu0 %281 }
  0xca   :  { %v72_v10 = vpop.permute.xlu1 %71 }
  0xcb   :  { %v134_v40 = vmul.f32 %v1195_v53, %v72_v10 }
  0xcd   :  { %v160_v37 = vpop.permute.xlu2 %159 }
  0xce   :  { %686 = vperm.xlu2 %992, %v636_v11   ;;  %v214_v61 = vmul.f32 %v1197_v54, %v160_v37 }
  0xcf   :  { %701 = vperm.xlu1 %991, %v639_v12   ;;  %v57_v50 = vpop.permute.xlu0 %56 }
  0xd0   :  { %v131_v2 = vmul.f32 %v1195_v53, %v57_v50  ;;  %v230_v5 = vadd.f32 %v214_v61, %v133_v1 }
  0xd3   :  { %v164_v16 = vpop.permute.xlu1 %163 }
  0xd4   :  { %v215_v38 = vmul.f32 %v1197_v54, %v164_v16 }
  0xd6   :  { %681 = vperm.xlu2 %992, %v635_v17   ;;  %v231_v43 = vadd.f32 %v215_v38, %v134_v40  ;;  %v52_v46 = vpop.permute.xlu2 %51 }
  0xd7   :  { %676 = vperm.xlu1 %991, %v634_v18   ;;  %v272_v41 = vpop.permute.xlu0 %271  ;;  %v130_v62 = vmul.f32 %v1195_v53, %v52_v46  ;;  %v934_v53 = vld [vmem:[%s1395_s3] sm:$0xff]  ;;  %v939_v18 = vld [vmem:[%s1395_s3 + $0x28] sm:$0xff] }
  0xd8   :  { %v343_v48 = vadd.f32 %v282_v34, %v231_v43 }
  0xda   :  { %v359_v55 = vmax.f32 %v343_v48, 0.0 }
  0xdc   :  { %v297_v29 = vpop.permute.xlu1 %296 }
  0xdd   :  { %v346_v30 = vadd.f32 %v297_v29, %v234_v25 }
  0xde   :  { %656 = vperm.xlu2 %992, %v630_v26  }
  0xdf   :  { %v362_v31 = vmax.f32 %v346_v30, 0.0  ;;  %671 = vperm.xlu1 %991, %v633_v45   ;;  %v152_v57 = vpop.permute.xlu2 %151  ;;  %v267_v11 = vpop.permute.xlu0 %266 }
  0xe0   :  { %v212_v63 = vmul.f32 %v1197_v54, %v152_v57 }
  0xe1   :  { %v374_v33 = vpack.c.bf16 %v362_v31, %v361_v32 }
  0xe2   :  { %v228_v4 = vadd.f32 %v212_v63, %v131_v2 }
  0xe3   :  { %543 = vmatpush.bf16.msra.mxu0 %v374_v33  ;;  %954 = vmatpush.bf16.msra.mxu3 %v374_v33 }
  0xe4   :  { %v340_v14 = vadd.f32 %v267_v11, %v228_v4 }
  0xe5   :  { %v156_v39 = vpop.permute.xlu1 %155 }
  0xe6   :  { %651 = vperm.xlu2 %992, %v629_v28   ;;  %v213_v36 = vmul.f32 %v1197_v54, %v156_v39 }
  0xe7   :  { %646 = vperm.xlu1 %991, %v628_v35   ;;  %v474_v26 = vpop.permute.xlu0 %473 }
  0xe8   :  { %v229_v0 = vadd.f32 %v213_v36, %v132_v59  ;;  %v262_v7 = vpop.permute.xlu2 %261 }
  0xea   :  { %v341_v6 = vadd.f32 %v272_v41, %v229_v0 }
  0xec   :  { %v357_v13 = vmax.f32 %v341_v6, 0.0 }
  0xee   :  { %v287_v49 = vpop.permute.xlu1 %286 }
  0xef   :  { %v344_v51 = vadd.f32 %v287_v49, %v232_v47  ;;  %v469_v29 = vpop.permute.xlu0 %468 }
  0xf1   :  { %v360_v52 = vmax.f32 %v344_v51, 0.0 }
  0xf3   :  { %v373_v56 = vpack.c.bf16 %v360_v52, %v359_v55  ;;  %v489_v55 = vpop.permute.xlu2 %488 }
  0xf5   :  { %544 = vmatpush.bf16.msra.mxu0 %v373_v56  ;;  %955 = vmatpush.bf16.msra.mxu3 %v373_v56 }
  0xf7   :  { %v444_v30 = vpop.permute.xlu0 %443 }
  0xf8   :  { %v148_v58 = vpop.permute.xlu1 %147 }
  0xf9   :  { %v211_v60 = vmul.f32 %v1197_v54, %v148_v58  ;;  %v356_v54 = vmax.f32 %v340_v14, 0.0 }
  0xfb   :  { %v227_v3 = vadd.f32 %v211_v60, %v130_v62  ;;  %v464_v63 = vpop.permute.xlu2 %463 }
  0xfd   :  { %v339_v10 = vadd.f32 %v262_v7, %v227_v3 }
  0xff   :  { %v355_v16 = vmax.f32 %v339_v10, 0.0  ;;  %v439_v32 = vpop.permute.xlu0 %438 }
 0x101   :  { %v277_v8 = vpop.permute.xlu1 %276  ;;  %v371_v17 = vpack.c.bf16 %v356_v54, %v355_v16 }
 0x102   :  { %v342_v9 = vadd.f32 %v277_v8, %v230_v5 }
 0x103   :  { %v459_v10 = vpop.permute.xlu2 %458 }
 0x104   :  { %v358_v12 = vmax.f32 %v342_v9, 0.0 }
 0x106   :  { %v372_v15 = vpack.c.bf16 %v358_v12, %v357_v13 }
 0x107   :  { %v414_v34 = vpop.permute.xlu0 %413 }
 0x108   :  { %545 = vmatpush.bf16.msra.mxu0 %v372_v15  ;;  %956 = vmatpush.bf16.msra.mxu3 %v372_v15 }
 0x109   :  { %v484_v25 = vpop.permute.xlu1 %483 }
 0x10b   :  { %v434_v12 = vpop.permute.xlu2 %433 }
 0x10c   :  { %546 = vmatpush.bf16.msra.mxu0 %v371_v17  ;;  %957 = vmatpush.bf16.msra.mxu3 %v371_v17 }
 0x10f   :  { %547 = vmatmul.bf16.vlgmr.msra.gmra.mxu0 %v934_v53  ;;  %572 = vmatmul.bf16.vlgmr.msra.gmra.mxu3 %v939_v18 }
 0x111   :  { %v479_v27 = vpop.permute.xlu1 %478 }
 0x119   :  { %v454_v45 = vpop.permute.xlu1 %453 }
 0x11f   :  { %552 = vmatmul.bf16.gmra.mxu0 %v935_v19  ;;  %577 = vmatmul.bf16.gmra.mxu3 %v940_v20 }
 0x121   :  { %v449_v31 = vpop.permute.xlu1 %448 }
 0x129   :  { %v1352_v33 = vpop.permute.xlu1 %423 }
 0x12f   :  { %557 = vmatmul.bf16.gmra.mxu0 %v936_v21  ;;  %582 = vmatmul.bf16.gmra.mxu3 %v941_v22 }
 0x131   :  { %v419_v38 = vpop.permute.xlu1 %418 }
 0x13f   :  { %562 = vmatmul.bf16.gmra.mxu0 %v937_v23  ;;  %v429_v23 = vpop.permute.xlu2 %428 }
 0x14f   :  { %567 = vmatmul.bf16.gmra.mxu0 %v938_v24 }
 0x18c   :  { %v548_v28 = vpop.f32.mrf.mxu0 }
 0x18d   :  { %v549_v37 = vadd.f32 %v548_v28, %v414_v34  ;;  %v942_v28 = vld [vmem:[%s1396_s5] sm:$0xff]  ;;  %v947_v34 = vld [vmem:[%s1396_s5 + $0x28] sm:$0xff] }
 0x18f   :  { %v588_v42 = vmax.f32 %v549_v37, 0.0  ;;  %v944_v37 = vld [vmem:[%s1396_s5 + $0x10] sm:$0xff] }
 0x192   :  { %v573_v35 = vpop.f32.mrf.mxu3 }
 0x193   :  { %v574_v3 = vadd.f32 %v573_v35, %v464_v63  ;;  %v948_v35 = vld [vmem:[%s1396_s5 + $0x30] sm:$0xff] }
 0x194   :  { %v550_v39 = vpop.f32.mrf.mxu0 }
 0x195   :  { %v551_v40 = vadd.f32 %v550_v39, %v419_v38  ;;  %v598_v8 = vmax.f32 %v574_v3, 0.0  ;;  %v949_v38 = vld [vmem:[%s1396_s5 + $0x38] sm:$0xff] }
 0x196   :  { %v945_v39 = vld [vmem:[%s1396_s5 + $0x18] sm:$0xff] }
 0x197   :  { %v589_v43 = vmax.f32 %v551_v40, 0.0  ;;  %v946_v40 = vld [vmem:[%s1396_s5 + $0x20] sm:$0xff] }
 0x199   :  { %v1354_v44 = vpack.c.bf16 %v589_v43, %v588_v42  ;;  %v717_v42 = vpop.permute.xlu2 %716  ;;  %v707_v43 = vpop.permute.xlu1 %706 }
 0x19a   :  { %v575_v46 = vpop.f32.mrf.mxu3 }
 0x19b   :  { %v576_v0 = vadd.f32 %v575_v46, %v469_v29 }
 0x19c   :  { %v553_v47 = vpop.f32.mrf.mxu0 }
 0x19d   :  { %v599_v5 = vmax.f32 %v576_v0, 0.0 }
 0x19f   :  { %v609_v9 = vpack.c.bf16 %v599_v5, %v598_v8  ;;  %v722_v5 = vpop.permute.xlu0 %721 }
 0x1a1   :  { %v702_v46 = vpop.permute.xlu1 %701 }
 0x1a2   :  { %v578_v48 = vpop.f32.mrf.mxu3 }
 0x1a3   :  { %v579_v60 = vadd.f32 %v578_v48, %v474_v26 }
 0x1a4   :  { %v555_v49 = vpop.f32.mrf.mxu0 }
 0x1a5   :  { %v600_v4 = vmax.f32 %v579_v60, 0.0  ;;  %v556_v24 = vadd.f32 %v555_v49, %v429_v23 }
 0x1a9   :  { %v677_v48 = vpop.permute.xlu1 %676 }
 0x1aa   :  { %v580_v50 = vpop.f32.mrf.mxu3 }
 0x1ab   :  { %v581_v58 = vadd.f32 %v580_v50, %v479_v27  ;;  %v554_v27 = vadd.f32 %v553_v47, %v1352_v33  ;;  %v943_v33 = vld [vmem:[%s1396_s5 + $0x8] sm:$0xff] }
 0x1ac   :  { %v558_v51 = vpop.f32.mrf.mxu0 }
 0x1ad   :  { %v601_v1 = vmax.f32 %v581_v58, 0.0  ;;  %v559_v21 = vadd.f32 %v558_v51, %v434_v12 }
 0x1af   :  { %v610_v6 = vpack.c.bf16 %v601_v1, %v600_v4  ;;  %v592_v29 = vmax.f32 %v559_v21, 0.0 }
 0x1b1   :  { %v672_v50 = vpop.permute.xlu1 %671 }
 0x1b2   :  { %v583_v52 = vpop.f32.mrf.mxu3 }
 0x1b3   :  { %v584_v57 = vadd.f32 %v583_v52, %v484_v25 }
 0x1b4   :  { %v560_v56 = vpop.f32.mrf.mxu0 }
 0x1b5   :  { %v602_v61 = vmax.f32 %v584_v57, 0.0  ;;  %v561_v18 = vadd.f32 %v560_v56, %v439_v32 }
 0x1b7   :  { %v593_v25 = vmax.f32 %v561_v18, 0.0 }
 0x1ba   :  { %v585_v36 = vpop.f32.mrf.mxu3 }
 0x1bb   :  { %v586_v41 = vadd.f32 %v585_v36, %v489_v55  ;;  %v647_v55 = vpop.permute.xlu1 %646 }
 0x1bc   :  { %v563_v59 = vpop.f32.mrf.mxu0 }
 0x1bd   :  { %v603_v62 = vmax.f32 %v586_v41, 0.0  ;;  %v564_v54 = vadd.f32 %v563_v59, %v444_v30  ;;  %v606_v30 = vpack.c.bf16 %v593_v25, %v592_v29 }
 0x1bf   :  { %v611_v2 = vpack.c.bf16 %v603_v62, %v602_v61  ;;  %v594_v22 = vmax.f32 %v564_v54, 0.0 }
 0x1c1   :  { %772 = vmatpush.bf16.msra.mxu1 %v611_v2  ;;  %958 = vmatpush.bf16.msra.mxu2 %v611_v2 }
 0x1c4   :  { %v565_v7 = vpop.f32.mrf.mxu0 }
 0x1c5   :  { %773 = vmatpush.bf16.msra.mxu1 %v610_v6  ;;  %959 = vmatpush.bf16.msra.mxu2 %v610_v6  ;;  %v566_v15 = vadd.f32 %v565_v7, %v449_v31  ;;  %v590_v31 = vmax.f32 %v554_v27, 0.0 }
 0x1c7   :  { %v595_v19 = vmax.f32 %v566_v15, 0.0  ;;  %v697_v15 = vpop.permute.xlu0 %696 }
 0x1c9   :  { %774 = vmatpush.bf16.msra.mxu1 %v609_v9  ;;  %960 = vmatpush.bf16.msra.mxu2 %v609_v9  ;;  %v607_v26 = vpack.c.bf16 %v595_v19, %v594_v22 }
 0x1cc   :  { %v568_v11 = vpop.f32.mrf.mxu0 }
 0x1cd   :  { %v569_v13 = vadd.f32 %v568_v11, %v454_v45  ;;  %v591_v45 = vmax.f32 %v556_v24, 0.0 }
 0x1cf   :  { %v596_v17 = vmax.f32 %v569_v13, 0.0  ;;  %v605_v32 = vpack.c.bf16 %v591_v45, %v590_v31  ;;  %v692_v24 = vpop.permute.xlu0 %691 }
 0x1d4   :  { %v570_v14 = vpop.f32.mrf.mxu0 }
 0x1d5   :  { %v571_v16 = vadd.f32 %v570_v14, %v459_v10 }
 0x1d7   :  { %v597_v53 = vmax.f32 %v571_v16, 0.0 }
 0x1d9   :  { %v608_v20 = vpack.c.bf16 %v597_v53, %v596_v17 }
 0x1db   :  { %775 = vmatpush.bf16.msra.mxu1 %v608_v20  ;;  %961 = vmatpush.bf16.msra.mxu2 %v608_v20 }
 0x1df   :  { %776 = vmatpush.bf16.msra.mxu1 %v607_v26  ;;  %962 = vmatpush.bf16.msra.mxu2 %v607_v26  ;;  %v667_v26 = vpop.permute.xlu0 %666 }
 0x1e3   :  { %777 = vmatpush.bf16.msra.mxu1 %v606_v30  ;;  %963 = vmatpush.bf16.msra.mxu2 %v606_v30 }
 0x1e7   :  { %778 = vmatpush.bf16.msra.mxu1 %v605_v32  ;;  %964 = vmatpush.bf16.msra.mxu2 %v605_v32 }
 0x1eb   :  { %779 = vmatpush.bf16.msra.mxu1 %v1354_v44  ;;  %965 = vmatpush.bf16.msra.mxu2 %v1354_v44  ;;  %v712_v44 = vpop.permute.xlu2 %711 }
 0x1ee   :  { %780 = vmatmul.bf16.vlgmr.msra.gmra.mxu1 %v942_v28  ;;  %805 = vmatmul.bf16.vlgmr.msra.gmra.mxu2 %v947_v34 }
 0x1f3   :  { %v687_v47 = vpop.permute.xlu2 %686 }
 0x1fb   :  { %v682_v49 = vpop.permute.xlu2 %681 }
 0x1fe   :  { %785 = vmatmul.bf16.gmra.mxu1 %v943_v33  ;;  %810 = vmatmul.bf16.gmra.mxu2 %v948_v35 }
 0x203   :  { %v657_v51 = vpop.permute.xlu2 %656 }
 0x20b   :  { %v652_v36 = vpop.permute.xlu2 %651 }
 0x20e   :  { %790 = vmatmul.bf16.gmra.mxu1 %v944_v37  ;;  %815 = vmatmul.bf16.gmra.mxu2 %v949_v38 }
 0x21e   :  { %795 = vmatmul.bf16.gmra.mxu1 %v945_v39  ;;  %v662_v39 = vpop.permute.xlu0 %661 }
 0x22e   :  { %800 = vmatmul.bf16.gmra.mxu1 %v946_v40 }
 0x26b   :  { %v781_v52 = vpop.f32.mrf.mxu1 }
 0x26c   :  { %v782_v57 = vadd.f32 %v781_v52, %v647_v55  ;;  %v850_v55 = vpop.permute.xlu0 %849 }
 0x26e   :  { %v821_v59 = vmax.f32 %v782_v57, 0.0 }
 0x271   :  { %v806_v56 = vpop.f32.mrf.mxu2 }
 0x272   :  { %v807_v53 = vadd.f32 %v806_v56, %v697_v15 }
 0x273   :  { %v783_v58 = vpop.f32.mrf.mxu1 }
 0x274   :  { %v784_v41 = vadd.f32 %v783_v58, %v652_v36  ;;  %v831_v22 = vmax.f32 %v807_v53, 0.0 }
 0x276   :  { %v822_v60 = vmax.f32 %v784_v41, 0.0 }
 0x278   :  { %v837_v61 = vpack.c.bf16 %v822_v60, %v821_v59 }
 0x279   :  { %v808_v62 = vpop.f32.mrf.mxu2 }
 0x27a   :  { %v809_v16 = vadd.f32 %v808_v62, %v702_v46 }
 0x27b   :  { %v786_v63 = vpop.f32.mrf.mxu1 }
 0x27c   :  { %v832_v19 = vmax.f32 %v809_v16, 0.0 }
 0x27e   :  { %v842_v23 = vpack.c.bf16 %v832_v19, %v831_v22 }
 0x281   :  { %v811_v0 = vpop.f32.mrf.mxu2 }
 0x282   :  { %v812_v12 = vadd.f32 %v811_v0, %v707_v43 }
 0x283   :  { %v788_v1 = vpop.f32.mrf.mxu1 }
 0x284   :  { %v833_v18 = vmax.f32 %v812_v12, 0.0  ;;  %v789_v40 = vadd.f32 %v788_v1, %v662_v39 }
 0x289   :  { %v813_v2 = vpop.f32.mrf.mxu2 }
 0x28a   :  { %v814_v9 = vadd.f32 %v813_v2, %v712_v44  ;;  %v787_v44 = vadd.f32 %v786_v63, %v657_v51 }
 0x28b   :  { %v791_v3 = vpop.f32.mrf.mxu1 }
 0x28c   :  { %v834_v54 = vmax.f32 %v814_v9, 0.0  ;;  %v792_v37 = vadd.f32 %v791_v3, %v667_v26 }
 0x28e   :  { %v843_v20 = vpack.c.bf16 %v834_v54, %v833_v18  ;;  %v825_v46 = vmax.f32 %v792_v37, 0.0 }
 0x291   :  { %v816_v4 = vpop.f32.mrf.mxu2 }
 0x292   :  { %v817_v7 = vadd.f32 %v816_v4, %v717_v42 }
 0x293   :  { %v793_v6 = vpop.f32.mrf.mxu1 }
 0x294   :  { %v835_v13 = vmax.f32 %v817_v7, 0.0  ;;  %v794_v34 = vadd.f32 %v793_v6, %v672_v50  ;;  %v845_v50 = vld [vmem:[%s1397_s7] sm:$0x1] }
 0x296   :  { %v826_v42 = vmax.f32 %v794_v34, 0.0 }
 0x298   :  { %v839_v52 = vpack.c.bf16 %v826_v42, %v825_v46 }
 0x299   :  { %v818_v8 = vpop.f32.mrf.mxu2 }
 0x29a   :  { %v819_v10 = vadd.f32 %v818_v8, %v722_v5 }
 0x29b   :  { %v796_v11 = vpop.f32.mrf.mxu1 }
 0x29c   :  { %v836_v14 = vmax.f32 %v819_v10, 0.0  ;;  %v797_v31 = vadd.f32 %v796_v11, %v677_v48 }
 0x29e   :  { %v844_v17 = vpack.c.bf16 %v836_v14, %v835_v13  ;;  %v827_v38 = vmax.f32 %v797_v31, 0.0 }
 0x2a0   :  { %852 = vmatpush.bf16.msrb.mxu2 %v844_v17 }
 0x2a3   :  { %v798_v21 = vpop.f32.mrf.mxu1 }
 0x2a4   :  { %853 = vmatpush.bf16.msrb.mxu2 %v843_v20  ;;  %v799_v45 = vadd.f32 %v798_v21, %v682_v49  ;;  %v823_v49 = vmax.f32 %v787_v44, 0.0 }
 0x2a6   :  { %v828_v33 = vmax.f32 %v799_v45, 0.0 }
 0x2a8   :  { %854 = vmatpush.bf16.msrb.mxu2 %v842_v23  ;;  %v840_v43 = vpack.c.bf16 %v828_v33, %v827_v38 }
 0x2ab   :  { %v801_v25 = vpop.f32.mrf.mxu1 }
 0x2ac   :  { %v802_v27 = vadd.f32 %v801_v25, %v687_v47  ;;  %v824_v47 = vmax.f32 %v789_v40, 0.0 }
 0x2ae   :  { %v829_v32 = vmax.f32 %v802_v27, 0.0  ;;  %v838_v48 = vpack.c.bf16 %v824_v47, %v823_v49 }
 0x2b3   :  { %v803_v29 = vpop.f32.mrf.mxu1 }
 0x2b4   :  { %v804_v30 = vadd.f32 %v803_v29, %v692_v24 }
 0x2b6   :  { %v830_v28 = vmax.f32 %v804_v30, 0.0 }
 0x2b8   :  { %v841_v35 = vpack.c.bf16 %v830_v28, %v829_v32 }
 0x2ba   :  { %855 = vmatpush.bf16.msrb.mxu2 %v841_v35 }
 0x2be   :  { %856 = vmatpush.bf16.msrb.mxu2 %v840_v43 }
 0x2c2   :  { %857 = vmatpush.bf16.msrb.mxu2 %v839_v52 }
 0x2c6   :  { %858 = vmatpush.bf16.msrb.mxu2 %v838_v48 }
 0x2ca   :  { %859 = vmatpush.bf16.msrb.mxu2 %v837_v61 }
 0x2cd   :  { %860 = vmatmul.bf16.vlgmr.msrb.gmra.mxu2 %v845_v50 }
 0x350   :  { %v861_v56 = vpop.f32.mrf.mxu2 }
 0x351   :  { %v862_v57 = vadd.f32 %v861_v56, %v850_v55 }
 0x353   :  { %865 = vst [vmem:[%s1398_s9] sm:$0x3] %v862_v57 }
 0x358   :  { %v863_v51 = vpop.f32.mrf.mxu2 }

</bundles_post_ra>
